<compile_context>
chip_gen: v6e
topology: v6e:2x2x1
jax: 0.10.0
libtpu: 0.0.40
codegen_flags: <defaults>
</compile_context>

<pallas_src>
import jax
import jax.numpy as jnp
from jax import lax
from jax.experimental import pallas as pl
from jax.experimental.pallas import tpu as pltpu


def _round_up(x, m):
    return (x + m - 1) // m * m


# ----------------------------------------------------------------------------
# Dense path: whole (padded, bf16) table resident in VMEM; one-hot @ table.
# ----------------------------------------------------------------------------
def _make_dense_kernel(*, bag_len, v_pad, has_weights, do_mean):

    def kernel(*refs):
        if has_weights:
            idx_ref, w_ref, table_ref, out_ref = refs
        else:
            idx_ref, table_ref, out_ref = refs
            w_ref = None

        idx = idx_ref[...]                               # (B_TILE, L) int32
        bt = idx.shape[0]

        # Hoisted 2-D iota over the padded vocabulary; broadcasting handles
        # the batch dim -- no (B, L, V) intermediates are ever materialized.
        lane = lax.broadcasted_iota(jnp.int32, (1, v_pad), 1)

        if has_weights:
            w = w_ref[...].astype(jnp.float32)           # (B_TILE, L) f32

        # Weighted one-hot scatter matrix, unrolled over the static bag length.
        s = jnp.zeros((bt, v_pad), jnp.float32)
        for l in range(bag_len):
            hit = idx[:, l:l + 1] == lane                # (B_TILE, V_pad) bool
            if has_weights:
                s = s + jnp.where(hit, w[:, l:l + 1], 0.0)
            else:
                s = s + hit.astype(jnp.float32)

        # Gather + weighted sum == S @ table on the MXU (bf16 in, f32 out).
        out = jnp.dot(s.astype(jnp.bfloat16), table_ref[...],
                      preferred_element_type=jnp.float32)

        if do_mean:
            wsum = jnp.sum(w, axis=1, keepdims=True)     # (B_TILE, 1)
            wsum = jnp.where(wsum == 0.0, 1.0, wsum)     # guard empty bags
            out = out / wsum                             # exact division

        out_ref[...] = out.astype(out_ref.dtype)

    return kernel


def _dense_forward(table_p, embed_dim, lookup, weights, mode):
    V_pad, D_pad = table_p.shape
    B, L = lookup.shape
    has_weights = weights is not None
    do_mean = has_weights and (mode == "mean")

    # Batch tile: sublane aligned, big enough to feed the MXU, and >= 2 grid
    # steps whenever possible so both v7x TensorCores get work.
    if B >= 512:
        B_TILE = 256      # fills the 256-wide MXU on v6e/v7x (prefer 128 on v5e)
    elif B >= 256:
        B_TILE = 128
    else:
        B_TILE = _round_up(B, 8)
        if B_TILE >= 16:  # keep grid[0] >= 2 for the two v7x TensorCores
            B_TILE = _round_up((B_TILE + 1) // 2, 8)
    B_pad = _round_up(B, B_TILE)

    idx_p = jnp.pad(lookup.astype(jnp.int32), ((0, B_pad - B), (0, 0)))

    operands = [idx_p]
    in_specs = [pl.BlockSpec((B_TILE, L), lambda b: (b, 0))]
    w_bytes = 0
    if has_weights:
        w_p = jnp.pad(weights.astype(jnp.float32), ((0, B_pad - B), (0, 0)))
        operands.append(w_p)
        in_specs.append(pl.BlockSpec((B_TILE, L), lambda b: (b, 0)))
        w_bytes = w_p.size * 4
    operands.append(table_p)
    # Constant block index: the table is DMA'd into VMEM once, not per B tile.
    in_specs.append(pl.BlockSpec((V_pad, D_pad), lambda b: (0, 0)))

    kernel = _make_dense_kernel(bag_len=L, v_pad=V_pad,
                                has_weights=has_weights, do_mean=do_mean)

    # VMEM budget derived from actual tile sizes (+ one-hot intermediate).
    vmem_bytes = (2 * table_p.size * table_p.dtype.itemsize   # table (dbl-buf)
                  + 4 * B_TILE * L * 4                        # idx + weights
                  + 2 * B_TILE * D_pad * 4                    # output tiles
                  + B_TILE * V_pad * 4                        # one-hot S
                  + (4 << 20))                                # slack
    vmem_limit = int(min(max(vmem_bytes, 8 << 20), 64 << 20))

    cost = pl.CostEstimate(
        flops=2 * B_pad * V_pad * D_pad,
        transcendentals=0,
        bytes_accessed=(table_p.size * table_p.dtype.itemsize
                        + idx_p.size * 4 + w_bytes + B_pad * D_pad * 4))

    out = pl.pallas_call(
        kernel,
        out_shape=jax.ShapeDtypeStruct((B_pad, D_pad), jnp.float32),
        grid=(B_pad // B_TILE,),
        in_specs=in_specs,
        out_specs=pl.BlockSpec((B_TILE, D_pad), lambda b: (b, 0)),
        compiler_params=pltpu.CompilerParams(
            dimension_semantics=("parallel",),
            vmem_limit_bytes=vmem_limit),
        cost_estimate=cost,
    )(*operands)

    return out[:B, :embed_dim]


# ----------------------------------------------------------------------------
# Gather path: table in HBM, scalar-prefetched indices, double-buffered DMA
# row gather, exact f32 weighted sum on the VPU.
# ----------------------------------------------------------------------------
def _make_gather_kernel(*, bag_len, has_weights, do_mean):

    def kernel(*refs):
        if has_weights:
            idx_smem, w_ref, table_hbm, out_ref, buf, sems = refs
        else:
            idx_smem, table_hbm, out_ref, buf, sems = refs
            w_ref = None

        b = pl.program_id(0)
        nb = pl.num_programs(0)
        slot = lax.rem(b, 2)

        def fetch(row, to_slot):
            base = row * bag_len
            for l in range(bag_len):                     # static unroll
                pltpu.make_async_copy(
                    table_hbm.at[idx_smem[base + l]],    # (D_pad,) HBM row
                    buf.at[to_slot, l],
                    sems.at[to_slot, l]).start()

        @pl.when(b == 0)
        def _():
            fetch(0, 0)                                  # prime slot 0

        @pl.when(b + 1 < nb)
        def _():
            fetch(b + 1, 1 - slot)                       # prefetch next bag

        for l in range(bag_len):                         # wait this bag's rows
            pltpu.make_async_copy(
                table_hbm.at[0], buf.at[slot, l], sems.at[slot, l]).wait()

        rows = buf[slot]                                 # (L, D_pad) f32
        d_pad = rows.shape[-1]

        if has_weights:
            w = w_ref[...].astype(jnp.float32)           # (1, L)

        acc = jnp.zeros((1, d_pad), jnp.float32)
        for l in range(bag_len):
            r = rows[l:l + 1, :]                         # (1, D_pad)
            if has_weights:
                acc = acc + r * w[:, l:l + 1]            # lane-broadcast mul
            else:
                acc = acc + r

        if do_mean:
            wsum = jnp.sum(w, axis=1, keepdims=True)     # (1, 1)
            wsum = jnp.where(wsum == 0.0, 1.0, wsum)
            acc = acc / wsum                             # exact division

        out_ref[...] = acc.astype(out_ref.dtype)

    return kernel


def _gather_forward(table_p, embed_dim, lookup, weights, mode):
    _, D_pad = table_p.shape
    B, L = lookup.shape
    has_weights = weights is not None
    do_mean = has_weights and (mode == "mean")

    idx_flat = lookup.astype(jnp.int32).reshape(-1)      # 1-D -> cheap in SMEM

    operands = [idx_flat]
    in_specs = []
    if has_weights:
        operands.append(weights.astype(jnp.float32))
        in_specs.append(pl.BlockSpec((1, L), lambda b, idx: (b, 0)))
    operands.append(table_p)
    in_specs.append(pl.BlockSpec(memory_space=pl.ANY))    # table stays in HBM

    kernel = _make_gather_kernel(bag_len=L, has_weights=has_weights,
                                 do_mean=do_mean)

    out = pl.pallas_call(
        kernel,
        out_shape=jax.ShapeDtypeStruct((B, D_pad), jnp.float32),
        grid_spec=pltpu.PrefetchScalarGridSpec(
            num_scalar_prefetch=1,
            grid=(B,),
            in_specs=in_specs,
            out_specs=pl.BlockSpec((1, D_pad), lambda b, idx: (b, 0)),
            scratch_shapes=[
                pltpu.VMEM((2, L, D_pad), jnp.float32),   # double row buffer
                pltpu.SemaphoreType.DMA((2, L)),
            ]),
        compiler_params=pltpu.CompilerParams(
            # manual double-buffering relies on sequential grid execution
            dimension_semantics=("arbitrary",)),
    )(*operands)

    return out[:, :embed_dim]


# ----------------------------------------------------------------------------
# Module wrapper (mirrors the PyTorch EmbeddingDictionary)
# ----------------------------------------------------------------------------
class EmbeddingDictionary:
    # bf16-padded tables up to this size use the VMEM-resident dense path.
    _DENSE_TABLE_BYTES = 8 << 20

    def __init__(self, dict_size, embed_dim, mode="mean", padding_idx=0,
                 key=None):
        if mode not in ("sum", "mean"):
            raise ValueError(f"Not supported mode type {mode}")
        if key is None:
            key = jax.random.PRNGKey(0)
        self.dict_size = dict_size
        self.embed_dim = embed_dim
        self.mode = mode

        V = dict_size + 1
        # Xavier-uniform init, padding row zeroed (as in the module).
        bound = (6.0 / (V + embed_dim)) ** 0.5
        table = jax.random.uniform(key, (V, embed_dim), jnp.float32,
                                   -bound, bound)
        self.table = table.at[padding_idx].set(0.0)

        # One-time padding / casting (never inside forward).
        D_pad = _round_up(embed_dim, 128)
        V_pad = _round_up(V, 128)
        # f32, lane-padded only: HBM row-gather path (exact).
        self._table_gather = jnp.pad(self.table,
                                     ((0, 0), (0, D_pad - embed_dim)))
        # bf16, fully padded: VMEM-resident dense path.  (In production keep
        # only the variant actually used.)
        self._table_dense = jnp.pad(self.table.astype(jnp.bfloat16),
                                    ((0, V_pad - V), (0, D_pad - embed_dim)))

    def __call__(self, lookup_tensor, weights_tensor=None, method="auto"):
        if method == "auto":
            dense_ok = self._table_dense.size * 2 <= self._DENSE_TABLE_BYTES
            method = "dense" if dense_ok else "gather"
        if method == "dense":
            return _dense_forward(self._table_dense, self.embed_dim,
                                  lookup_tensor, weights_tensor, self.mode)
        if method == "gather":
            return _gather_forward(self._table_gather, self.embed_dim,
                                   lookup_tensor, weights_tensor, self.mode)
        raise ValueError(f"unknown method {method}")


if __name__ == "__main__":
    dict_size, embed_dim = 1000, 96       # V = 1001 -> 1024, D -> 128 lanes
    B, L = 16, 8

    key = jax.random.PRNGKey(0)
    k_tbl, k_idx, k_w = jax.random.split(key, 3)

    emb_mean = EmbeddingDictionary(dict_size, embed_dim, mode="mean", key=k_tbl)
    emb_sum = EmbeddingDictionary(dict_size, embed_dim, mode="sum", key=k_tbl)

    lookup = jax.random.randint(k_idx, (B, L), 0, dict_size + 1, dtype=jnp.int32)
    lookup = lookup.at[0, :3].set(0)      # include some padding-idx entries
    weights = jax.random.uniform(k_w, (B, L), jnp.float32, 0.1, 1.0)

    table = emb_mean.table
    gathered = table[lookup]                                  # (B, L, D)
    ref_wsum = jnp.einsum("bl,bld->bd", weights, gathered)    # weighted sum
    ref_mean = ref_wsum / jnp.sum(weights, axis=1, keepdims=True)
    ref_sum = jnp.sum(gathered, axis=1)                       # unweighted sum

    # -- dense path (bf16 MXU): mean w/ weights, no weights, sum w/ weights --
    out = jax.block_until_ready(emb_mean(lookup, weights, method="dense"))
    assert out.shape == (B, embed_dim)
    assert jnp.allclose(out, ref_mean, atol=1e-2, rtol=2e-2), "dense mean"

    out = jax.block_until_ready(emb_mean(lookup, None, method="dense"))
    assert jnp.allclose(out, ref_sum, atol=1e-2, rtol=2e-2), "dense no-weights"

    out = jax.block_until_ready(emb_sum(lookup, weights, method="dense"))
    assert jnp.allclose(out, ref_wsum, atol=1e-2, rtol=2e-2), "dense sum"

    # -- gather path (f32, exact): mean w/ weights, no weights ---------------
    out = jax.block_until_ready(emb_mean(lookup, weights, method="gather"))
    assert jnp.allclose(out, ref_mean, atol=1e-4, rtol=1e-4), "gather mean"

    out = jax.block_until_ready(emb_mean(lookup, None, method="gather"))
    assert jnp.allclose(out, ref_sum, atol=1e-4, rtol=1e-4), "gather no-weights"

    print("KERNEL_OK")
</pallas_src>

<mosaic_0001>
module attributes {stable_mosaic.version = 11 : i64} {
  func.func @kernel(%arg0: i32, %arg1: memref<8x8xi32, #tpu.memory_space<vmem>>, %arg2: memref<8x8xf32, #tpu.memory_space<vmem>>, %arg3: memref<1024x128xbf16, #tpu.memory_space<vmem>>, %arg4: memref<8x128xf32, #tpu.memory_space<vmem>>) attributes {dimension_semantics = [#tpu.dimension_semantics<parallel>], iteration_bounds = array<i64: 2>, scalar_prefetch = 0 : i64, scratch_operands = 0 : i64, tpu.core_type = #tpu.core_type<tc>, window_params = [{transform_indices = @transform_0, window_bounds = array<i64: 8, 8>}, {transform_indices = @transform_1, window_bounds = array<i64: 8, 8>}, {pipeline_mode = #tpu.pipeline_mode<synchronous>, transform_indices = @transform_2, window_bounds = array<i64: 1024, 128>}, {transform_indices = @transform_3, window_bounds = array<i64: 8, 128>}]} {
    %c0 = arith.constant 0 : index
    %c0_0 = arith.constant 0 : index
    %0 = vector.load %arg1[%c0, %c0_0] : memref<8x8xi32, #tpu.memory_space<vmem>>, vector<8x8xi32>
    %1 = tpu.iota {dimensions = array<i32: 1>} : vector<1x1024xi32>
    %c0_1 = arith.constant 0 : index
    %c0_2 = arith.constant 0 : index
    %2 = vector.load %arg2[%c0_1, %c0_2] : memref<8x8xf32, #tpu.memory_space<vmem>>, vector<8x8xf32>
    %cst = arith.constant 0.000000e+00 : f32
    %3 = vector.broadcast %cst : f32 to vector<8x1024xf32>
    %4 = vector.extract_strided_slice %0 {offsets = [0, 0], sizes = [8, 1], strides = [1, 1]} : vector<8x8xi32> to vector<8x1xi32>
    %5 = vector.broadcast %4 : vector<8x1xi32> to vector<8x1024xi32>
    %6 = vector.broadcast %1 : vector<1x1024xi32> to vector<8x1024xi32>
    %7 = arith.cmpi eq, %5, %6 : vector<8x1024xi32>
    %8 = vector.extract_strided_slice %2 {offsets = [0, 0], sizes = [8, 1], strides = [1, 1]} : vector<8x8xf32> to vector<8x1xf32>
    %cst_3 = arith.constant 0.000000e+00 : f32
    %9 = vector.shape_cast %8 : vector<8x1xf32> to vector<8x1xf32>
    %10 = vector.broadcast %9 : vector<8x1xf32> to vector<8x1024xf32>
    %11 = vector.broadcast %cst_3 : f32 to vector<8x1024xf32>
    %12 = arith.select %7, %10, %11 : vector<8x1024xi1>, vector<8x1024xf32>
    %13 = arith.addf %3, %12 : vector<8x1024xf32>
    %14 = vector.extract_strided_slice %0 {offsets = [0, 1], sizes = [8, 1], strides = [1, 1]} : vector<8x8xi32> to vector<8x1xi32>
    %15 = vector.broadcast %14 : vector<8x1xi32> to vector<8x1024xi32>
    %16 = vector.broadcast %1 : vector<1x1024xi32> to vector<8x1024xi32>
    %17 = arith.cmpi eq, %15, %16 : vector<8x1024xi32>
    %18 = vector.extract_strided_slice %2 {offsets = [0, 1], sizes = [8, 1], strides = [1, 1]} : vector<8x8xf32> to vector<8x1xf32>
    %cst_4 = arith.constant 0.000000e+00 : f32
    %19 = vector.shape_cast %18 : vector<8x1xf32> to vector<8x1xf32>
    %20 = vector.broadcast %19 : vector<8x1xf32> to vector<8x1024xf32>
    %21 = vector.broadcast %cst_4 : f32 to vector<8x1024xf32>
    %22 = arith.select %17, %20, %21 : vector<8x1024xi1>, vector<8x1024xf32>
    %23 = arith.addf %13, %22 : vector<8x1024xf32>
    %24 = vector.extract_strided_slice %0 {offsets = [0, 2], sizes = [8, 1], strides = [1, 1]} : vector<8x8xi32> to vector<8x1xi32>
    %25 = vector.broadcast %24 : vector<8x1xi32> to vector<8x1024xi32>
    %26 = vector.broadcast %1 : vector<1x1024xi32> to vector<8x1024xi32>
    %27 = arith.cmpi eq, %25, %26 : vector<8x1024xi32>
    %28 = vector.extract_strided_slice %2 {offsets = [0, 2], sizes = [8, 1], strides = [1, 1]} : vector<8x8xf32> to vector<8x1xf32>
    %cst_5 = arith.constant 0.000000e+00 : f32
    %29 = vector.shape_cast %28 : vector<8x1xf32> to vector<8x1xf32>
    %30 = vector.broadcast %29 : vector<8x1xf32> to vector<8x1024xf32>
    %31 = vector.broadcast %cst_5 : f32 to vector<8x1024xf32>
    %32 = arith.select %27, %30, %31 : vector<8x1024xi1>, vector<8x1024xf32>
    %33 = arith.addf %23, %32 : vector<8x1024xf32>
    %34 = vector.extract_strided_slice %0 {offsets = [0, 3], sizes = [8, 1], strides = [1, 1]} : vector<8x8xi32> to vector<8x1xi32>
    %35 = vector.broadcast %34 : vector<8x1xi32> to vector<8x1024xi32>
    %36 = vector.broadcast %1 : vector<1x1024xi32> to vector<8x1024xi32>
    %37 = arith.cmpi eq, %35, %36 : vector<8x1024xi32>
    %38 = vector.extract_strided_slice %2 {offsets = [0, 3], sizes = [8, 1], strides = [1, 1]} : vector<8x8xf32> to vector<8x1xf32>
    %cst_6 = arith.constant 0.000000e+00 : f32
    %39 = vector.shape_cast %38 : vector<8x1xf32> to vector<8x1xf32>
    %40 = vector.broadcast %39 : vector<8x1xf32> to vector<8x1024xf32>
    %41 = vector.broadcast %cst_6 : f32 to vector<8x1024xf32>
    %42 = arith.select %37, %40, %41 : vector<8x1024xi1>, vector<8x1024xf32>
    %43 = arith.addf %33, %42 : vector<8x1024xf32>
    %44 = vector.extract_strided_slice %0 {offsets = [0, 4], sizes = [8, 1], strides = [1, 1]} : vector<8x8xi32> to vector<8x1xi32>
    %45 = vector.broadcast %44 : vector<8x1xi32> to vector<8x1024xi32>
    %46 = vector.broadcast %1 : vector<1x1024xi32> to vector<8x1024xi32>
    %47 = arith.cmpi eq, %45, %46 : vector<8x1024xi32>
    %48 = vector.extract_strided_slice %2 {offsets = [0, 4], sizes = [8, 1], strides = [1, 1]} : vector<8x8xf32> to vector<8x1xf32>
    %cst_7 = arith.constant 0.000000e+00 : f32
    %49 = vector.shape_cast %48 : vector<8x1xf32> to vector<8x1xf32>
    %50 = vector.broadcast %49 : vector<8x1xf32> to vector<8x1024xf32>
    %51 = vector.broadcast %cst_7 : f32 to vector<8x1024xf32>
    %52 = arith.select %47, %50, %51 : vector<8x1024xi1>, vector<8x1024xf32>
    %53 = arith.addf %43, %52 : vector<8x1024xf32>
    %54 = vector.extract_strided_slice %0 {offsets = [0, 5], sizes = [8, 1], strides = [1, 1]} : vector<8x8xi32> to vector<8x1xi32>
    %55 = vector.broadcast %54 : vector<8x1xi32> to vector<8x1024xi32>
    %56 = vector.broadcast %1 : vector<1x1024xi32> to vector<8x1024xi32>
    %57 = arith.cmpi eq, %55, %56 : vector<8x1024xi32>
    %58 = vector.extract_strided_slice %2 {offsets = [0, 5], sizes = [8, 1], strides = [1, 1]} : vector<8x8xf32> to vector<8x1xf32>
    %cst_8 = arith.constant 0.000000e+00 : f32
    %59 = vector.shape_cast %58 : vector<8x1xf32> to vector<8x1xf32>
    %60 = vector.broadcast %59 : vector<8x1xf32> to vector<8x1024xf32>
    %61 = vector.broadcast %cst_8 : f32 to vector<8x1024xf32>
    %62 = arith.select %57, %60, %61 : vector<8x1024xi1>, vector<8x1024xf32>
    %63 = arith.addf %53, %62 : vector<8x1024xf32>
    %64 = vector.extract_strided_slice %0 {offsets = [0, 6], sizes = [8, 1], strides = [1, 1]} : vector<8x8xi32> to vector<8x1xi32>
    %65 = vector.broadcast %64 : vector<8x1xi32> to vector<8x1024xi32>
    %66 = vector.broadcast %1 : vector<1x1024xi32> to vector<8x1024xi32>
    %67 = arith.cmpi eq, %65, %66 : vector<8x1024xi32>
    %68 = vector.extract_strided_slice %2 {offsets = [0, 6], sizes = [8, 1], strides = [1, 1]} : vector<8x8xf32> to vector<8x1xf32>
    %cst_9 = arith.constant 0.000000e+00 : f32
    %69 = vector.shape_cast %68 : vector<8x1xf32> to vector<8x1xf32>
    %70 = vector.broadcast %69 : vector<8x1xf32> to vector<8x1024xf32>
    %71 = vector.broadcast %cst_9 : f32 to vector<8x1024xf32>
    %72 = arith.select %67, %70, %71 : vector<8x1024xi1>, vector<8x1024xf32>
    %73 = arith.addf %63, %72 : vector<8x1024xf32>
    %74 = vector.extract_strided_slice %0 {offsets = [0, 7], sizes = [8, 1], strides = [1, 1]} : vector<8x8xi32> to vector<8x1xi32>
    %75 = vector.broadcast %74 : vector<8x1xi32> to vector<8x1024xi32>
    %76 = vector.broadcast %1 : vector<1x1024xi32> to vector<8x1024xi32>
    %77 = arith.cmpi eq, %75, %76 : vector<8x1024xi32>
    %78 = vector.extract_strided_slice %2 {offsets = [0, 7], sizes = [8, 1], strides = [1, 1]} : vector<8x8xf32> to vector<8x1xf32>
    %cst_10 = arith.constant 0.000000e+00 : f32
    %79 = vector.shape_cast %78 : vector<8x1xf32> to vector<8x1xf32>
    %80 = vector.broadcast %79 : vector<8x1xf32> to vector<8x1024xf32>
    %81 = vector.broadcast %cst_10 : f32 to vector<8x1024xf32>
    %82 = arith.select %77, %80, %81 : vector<8x1024xi1>, vector<8x1024xf32>
    %83 = arith.addf %73, %82 : vector<8x1024xf32>
    %84 = arith.truncf %83 : vector<8x1024xf32> to vector<8x1024xbf16>
    %c0_11 = arith.constant 0 : index
    %c0_12 = arith.constant 0 : index
    %85 = vector.load %arg3[%c0_11, %c0_12] : memref<1024x128xbf16, #tpu.memory_space<vmem>>, vector<1024x128xbf16>
    %cst_13 = arith.constant dense<0.000000e+00> : vector<8x128xf32>
    %86 = tpu.matmul %84, %85, %cst_13 {dimension_numbers = #tpu.dot_dimension_numbers<[1], [0], [0], [1], [0, 0, 1, 1], [], []>} : vector<8x1024xbf16>, vector<1024x128xbf16>, vector<8x128xf32> -> vector<8x128xf32>
    %cst_14 = arith.constant dense<0.000000e+00> : vector<8xf32>
    %87 = vector.multi_reduction <add>, %2, %cst_14 [1] : vector<8x8xf32> to vector<8xf32>
    %88 = vector.shape_cast %87 : vector<8xf32> to vector<8x1xf32>
    %cst_15 = arith.constant 0.000000e+00 : f32
    %89 = vector.broadcast %cst_15 : f32 to vector<8x1xf32>
    %90 = arith.cmpf oeq, %88, %89 : vector<8x1xf32>
    %cst_16 = arith.constant 1.000000e+00 : f32
    %91 = vector.broadcast %cst_16 : f32 to vector<8x1xf32>
    %92 = arith.select %90, %91, %88 : vector<8x1xi1>, vector<8x1xf32>
    %93 = vector.broadcast %92 : vector<8x1xf32> to vector<8x128xf32>
    %94 = arith.divf %86, %93 : vector<8x128xf32>
    %c0_17 = arith.constant 0 : index
    %c0_18 = arith.constant 0 : index
    %95 = vector.load %arg4[%c0_17, %c0_18] : memref<8x128xf32, #tpu.memory_space<vmem>>, vector<8x128xf32>
    tpu.vector_store %arg4[%c0_17, %c0_18], %94 {strides = array<i32>} : memref<8x128xf32, #tpu.memory_space<vmem>>, vector<8x128xf32>,
    return
  }
  func.func @transform_0(%arg0: i32) -> (i32, i32) {
    %c0_i32 = arith.constant 0 : i32
    %c0_i32_0 = arith.constant 0 : i32
    return %arg0, %c0_i32 : i32, i32
  }
  func.func @transform_1(%arg0: i32) -> (i32, i32) {
    %c0_i32 = arith.constant 0 : i32
    %c0_i32_0 = arith.constant 0 : i32
    return %arg0, %c0_i32 : i32, i32
  }
  func.func @transform_2(%arg0: i32) -> (i32, i32) {
    %c0_i32 = arith.constant 0 : i32
    %c0_i32_0 = arith.constant 0 : i32
    %c0_i32_1 = arith.constant 0 : i32
    return %c0_i32, %c0_i32_0 : i32, i32
  }
  func.func @transform_3(%arg0: i32) -> (i32, i32) {
    %c0_i32 = arith.constant 0 : i32
    %c0_i32_0 = arith.constant 0 : i32
    return %arg0, %c0_i32 : i32, i32
  }
}

</mosaic_0001>

<bundles_post_ra>
// kernel: tpu_custom_call.1
= control target key start
LH: loop header
LB: loop body
LE: loop exit
PB: predicated region body
PF: predicated region fallthrough
CT: control target
= control target key end

     0   :  { %8 = vsyncpa [#allocation3], 0  ;;  %s2098_s0 = inlined_call_operand.vmem [shape: s32[16,8], index: 0, kind: input, shape index: {}]   ;;  %s2099_s1 = inlined_call_operand.vmem [shape: f32[16,8], index: 1, kind: input, shape index: {}]   ;;  %s2100_s2 = inlined_call_operand.hbm [shape: bf16[1024,128], index: 2, kind: input, shape index: {}]   ;;  %s2101_s3 = inlined_call_operand.hbm [shape: f32[16,128], index: 3, kind: output, shape index: {}]  }
   0x1   :  { %9 = vsyncpa [#allocation4], 0 }
   0x2   :  { %11 = vsyncpa [#allocation4 + $0x1], 0  ;;  %s1674_s12 = smov 0   ;;  %s1676_s13 = smov 0  }
   0x3   :  { %s1678_s14 = smov 0   ;;  %s1680_s15 = smov 0  }
   0x4 LB: > { %s1695_s16 = sadd.s32 4294967295, %s1640_s15   ;;  %s1245_s17 = sadd.s32 4294967294, %s1640_s15   ;;  %s1640_s15 = sphi %s1680_s15, %s2109_s15   ;;  %s1636_s14 = sphi %s1678_s14, %s2108_s14   ;;  %s1632_s13 = sphi %s1676_s13, %s2107_s13   ;;  %s1628_s12 = sphi %s1674_s12, %s2106_s12  }
   0x5   : > { %s1699_s18 = sadd.s32 1, %s1640_s15   ;;  %s97_s19 = sadd.s32 1, %s1636_s14 }
   0x6   : > { %s94_s20 = ssub.s32 %s1640_s15, %s1699_s18  ;;  %p107_p0 = scmp.ne.s32.totalorder %s1636_s14, %s1632_s13 }
   0x7   : > { %p95_p1 = scmp.eq.s32.totalorder %s94_s20, 0  ;;  %p108_p2 = scmp.eq.s32.totalorder %s1695_s16, 1 }
   0x8   : > { %p113_p3 = scmp.ne.s32.totalorder %s1632_s13, %s1628_s12  ;;  %p114_p4 = scmp.eq.s32.totalorder %s1245_s17, 1 }
   0x9   : > { %s1710_s21 = scalar_select %p95_p1, %s1636_s14, %s97_s19  }
   0xa   : > { %p1712_p5 = por %p108_p2, %p107_p0  ;;  %p1716_p6 = por %p114_p4, %p113_p3 }
   0xb   : > { %p1246_p7 = scmp.ge.s32.totalorder %s1640_s15, 1  ;;  %p121_p8 = scmp.lt.s32.totalorder %s1640_s15, 3 }
   0xc   : > { %s2103_s23 = scalar_select %p1716_p6, 1, 0 }
   0xd   : > { %p1424_p9 = scmp.eq.s32.totalorder %s1695_s16, 0  ;;  %p1723_p10 = pnand %p1246_p7, %p121_p8 }
   0xe   : > { %s1642_s25 = smov [#allocation2]  }
   0xf   : > { %s133_s26 = sshll.u32 %s1642_s25, 4  ;;  %p1416_p11 = pneg %p1723_p10  ;;  %s134_s26 = int_to_ptr.vmem [resolvable:$true] %s133_s26 }
  0x10   : > { %s1561_s27 = scalar_lea.vmem %s134_s26, 8192  ;;  %p1569_p3 = scmp.lt.s32.totalorder %s134_s26, %s134_s26 }
  0x11   : > { %p1417_p12 = pnand %p1424_p9, %p1416_p11  ;;  %p1562_p0 = scmp.ne.s32.totalorder %s134_s26, %s1561_s27 }
  0x12   : > { %p1570_p4 = scmp.lt.s32.totalorder %s1561_s27, %s1561_s27 }
  0x13   : > { %p1552_p13 = pneg %p1417_p12 }
  0x14   : > { %p1571_p6 = por %p1570_p4, %p1569_p3 }
  0x15   : > { %p1564_p1 = pnand %p1562_p0, %p1552_p13 }
  0x17   : > { %p1565_p2 = pneg %p1564_p1 }
  0x19   : > { %p1572_p7 = pnand %p1571_p6, %p1565_p2 }
  0x1b   : > { %1575 = shalt.err (!%p1572_p7)
}
  0x1c   : > { %s1643_s28 = smov 64   ;;  %s1644_s29 = smov 4  }
  0x1d   : > { %1419 = dma.hbm_to_vmem [thread:$0]  (!%p1417_p12), %s2100_s2, 8192, %s134_s26, [#allocation3], %s1643_s28, %s1643_s28, %s1644_s29  }
  0x1e   : > { %163 = sbr.rel (%p1723_p10) target bundleno = 464 (0x1d0), region = 32 }
  0x23   : > { %1619 = dma.done.wait (%p1424_p9), [#allocation3], 8192  }
  0x24   : > { %1621 = vsyncadd (%p1424_p9), [#allocation3], 4294959104  ;;  %p190_p8 = scmp.lt.s32.totalorder %s1695_s16, 1  ;;  %v1645_v0 = vmov 0   ;;  %v1646_v3 = vmov 1   ;;  %v1647_v4 = vmov 2   ;;  %v200_v45 = vlaneseq }
  0x25   : > { %1472 = vset.pattern.permute.xlu1 %v1645_v0  ;;  %1470 = vset.pattern.permute.xlu0 %v1645_v0  ;;  %v1484_v5 = vld [vmem:[#allocation2 + $0x78] sm:$0xff]   ;;  %v1648_v9 = vmov 3   ;;  %v1649_v10 = vmov 4   ;;  %v1488_v11 = vld [vmem:[#allocation2 + $0x70] sm:$0xff]   ;;  %v1492_v15 = vld [vmem:[#allocation2 + $0x68] sm:$0xff]   ;;  %v1650_v17 = vmov 5  }
  0x26   : > { %s191_s5 = scalar_select %p190_p8, %s1695_s16, 1  ;;  %v1485_v6 = vld [vmem:[#allocation2 + $0xf8] sm:$0xff]   ;;  %1322 = vmatprep.subr.bf16.mxu0 %v1484_v5  ;;  %v1489_v12 = vld [vmem:[#allocation2 + $0xf0] sm:$0xff]   ;;  %v1493_v16 = vld [vmem:[#allocation2 + $0xe8] sm:$0xff]   ;;  %v1651_v24 = vmov 7   ;;  %v1652_v33 = vmov 6  }
  0x27   : > { %v1486_v7 = vld [vmem:[#allocation2 + $0x38] sm:$0xff]   ;;  %1344 = vmatprep.subr.bf16.mxu1 %v1485_v6  ;;  %v1490_v13 = vld [vmem:[#allocation2 + $0x30] sm:$0xff]   ;;  %v1494_v18 = vld [vmem:[#allocation2 + $0x28] sm:$0xff]   ;;  %vm1139_vm0 = vcmask 64512   ;;  %v1771_v47 = vand.u32 127, %v200_v45  ;;  %s187_s19 = sand.u32 1, %s1632_s13  }
  0x28   : > { %s1252_s6 = sshll.u32 %s191_s5, 3  ;;  %v1487_v8 = vld [vmem:[#allocation2 + $0xb8] sm:$0xff]   ;;  %1323 = vmatpush3.bf16.msra.mxu0 %v1486_v7  ;;  %v1491_v14 = vld [vmem:[#allocation2 + $0xb0] sm:$0xff]   ;;  %v1495_v19 = vld [vmem:[#allocation2 + $0xa8] sm:$0xff]   ;;  %s1251_s20 = sshll.u32 %s187_s19, 3 }
  0x29   : > { %s197_s9 = scalar_lea.vmem %s2099_s1, %s1252_s6  ;;  %s193_s17 = scalar_lea.vmem %s2098_s0, %s1252_s6  ;;  %1345 = vmatpush3.bf16.msra.mxu1 %v1487_v8  ;;  %1324 = vmatprep.subr.bf16.mxu0 %v1488_v11  ;;  %v1496_v20 = vld [vmem:[#allocation2 + $0x60] sm:$0xff]   ;;  %v1500_v25 = vld [vmem:[#allocation2 + $0x58] sm:$0xff]   ;;  %v1504_v29 = vld [vmem:[#allocation2 + $0x50] sm:$0xff]   ;;  %v1778_v50 = vadd.s32 128, %v1771_v47  ;;  %v1781_v51 = vadd.s32 384, %v1771_v47  ;;  %v1792_v54 = vadd.s32 256, %v1771_v47 }
  0x2a   : > { %v1748_v1 = vld [vmem:[%s197_s9] sm:$0xff]  ;;  %1346 = vmatprep.subr.bf16.mxu1 %v1489_v12  ;;  %v1501_v26 = vld [vmem:[#allocation2 + $0xd8] sm:$0xff]   ;;  %v1505_v30 = vld [vmem:[#allocation2 + $0xd0] sm:$0xff]   ;;  %v1795_v55 = vadd.s32 640, %v1771_v47  ;;  %v1798_v56 = vadd.s32 896, %v1771_v47  ;;  %s1319_s24 = sshll.u32 %s1695_s16, 7 }
  0x2b   : > { %v1750_v2 = vld [vmem:[%s193_s17] sm:$0xff]  ;;  %223 = vperm.xlu1 %1472, %v1748_v1   ;;  %v1502_v27 = vld [vmem:[#allocation2 + $0x18] sm:$0xff]   ;;  %v1506_v31 = vld [vmem:[#allocation2 + $0x10] sm:$0xff]   ;;  %v1140_v44 = vsel %vm1139_vm0, %v1748_v1, 0.0  ;;  %s189_s25 = scalar_lea.vmem [#allocation5], %s1251_s20  ;;  %s1160_s29 = scalar_lea.hbm %s2101_s3, %s1319_s24 }
  0x2c   : > { %211 = vperm.xlu0 %1470, %v1750_v2   ;;  %1325 = vmatpush3.bf16.msra.mxu0 %v1490_v13  ;;  %v1497_v21 = vld [vmem:[#allocation2 + $0xe0] sm:$0xff]   ;;  %v1503_v28 = vld [vmem:[#allocation2 + $0x98] sm:$0xff]   ;;  %v1507_v32 = vld [vmem:[#allocation2 + $0x90] sm:$0xff]   ;;  %s1162_s26 = sshll.u32 %s189_s25, 4  ;;  %s1149_s30 = scalar_lea.sflag [#allocation4], %s187_s19  ;;  %s1163_s26 = int_to_ptr.vmem [resolvable:$true] %s1162_s26 }
  0x2d   : > { %1347 = vmatpush3.bf16.msra.mxu1 %v1491_v14  ;;  %1326 = vmatprep.subr.bf16.mxu0 %v1492_v15  ;;  %v1498_v22 = vld [vmem:[#allocation2 + $0x20] sm:$0xff]   ;;  %v1508_v34 = vld [vmem:[#allocation2 + $0x48] sm:$0xff]   ;;  %v1516_v42 = vld [vmem:[#allocation2 + $0x178] sm:$0xff]   ;;  %s1576_s4 = scalar_lea.vmem %s1163_s26, 128  ;;  %s1653_s5 = smov [#allocation5]  }
  0x2e   : > { %1348 = vmatprep.subr.bf16.mxu1 %v1493_v16  ;;  %v1499_v23 = vld [vmem:[#allocation2 + $0xa0] sm:$0xff]   ;;  %v1509_v35 = vld [vmem:[#allocation2 + $0xc8] sm:$0xff]   ;;  %v1517_v43 = vld [vmem:[#allocation2 + $0x1f8] sm:$0xff]   ;;  %p1577_p6 = scmp.ne.s32.totalorder %s1163_s26, %s1576_s4  ;;  %s1580_s6 = sshll.u32 %s1653_s5, 4  ;;  %s1581_s6 = int_to_ptr.vmem [resolvable:$false] %s1580_s6 }
  0x2f   : > { %1473 = vset.pattern.permute.xlu1 %v1646_v3  ;;  %v1510_v36 = vld [vmem:[#allocation2 + $0x8] sm:$0xff]   ;;  %v1512_v38 = vld [vmem:[#allocation2 + $0x40] sm:$0xff]   ;;  %s1582_s16 = scalar_lea.vmem %s1581_s6, 256  ;;  %p1583_p11 = scmp.lt.s32.totalorder %s1163_s26, %s1581_s6 }
  0x30   : > { %1471 = vset.pattern.permute.xlu0 %v1646_v3  ;;  %254 = vperm.xlu1 %1473, %v1748_v1   ;;  %v1511_v37 = vld [vmem:[#allocation2 + $0x88] sm:$0xff]   ;;  %v1513_v39 = vld [vmem:[#allocation2 + $0xc0] sm:$0xff]   ;;  %p1578_p9 = pnand %p1577_p6, %p1712_p5  ;;  %p1584_p12 = scmp.lt.s32.totalorder %s1582_s16, %s1576_s4 }
  0x31   : > { %243 = vperm.xlu0 %1471, %v1750_v2   ;;  %1327 = vmatpush3.bf16.msra.mxu0 %v1494_v18  ;;  %v1514_v40 = vld [vmem:[#allocation2] sm:$0xff]  }
  0x32   : > { %1349 = vmatpush3.bf16.msra.mxu1 %v1495_v19  ;;  %1328 = vmatprep.subr.bf16.mxu0 %v1496_v20  ;;  %v1515_v41 = vld [vmem:[#allocation2 + $0x80] sm:$0xff]   ;;  %p1579_p10 = pneg %p1578_p9  ;;  %p1585_p13 = por %p1584_p12, %p1583_p11 }
  0x33   : > { %1350 = vmatprep.subr.bf16.mxu1 %v1497_v21 }
  0x34   : > { %1474 = vset.pattern.permute.xlu1 %v1647_v4  ;;  %p1586_p0 = pnand %p1585_p13, %p1579_p10 }
  0x35   : > { %1475 = vset.pattern.permute.xlu0 %v1647_v4  ;;  %274 = vperm.xlu1 %1474, %v1750_v2  }
  0x36   : > { %285 = vperm.xlu0 %1475, %v1748_v1   ;;  %1329 = vmatpush3.bf16.msra.mxu0 %v1498_v22 }
  0x37   : > { %1351 = vmatpush3.bf16.msra.mxu1 %v1499_v23  ;;  %1330 = vmatprep.subr.bf16.mxu0 %v1500_v25 }
  0x38   : > { %1352 = vmatprep.subr.bf16.mxu1 %v1501_v26 }
  0x39   : > { %1476 = vset.pattern.permute.xlu1 %v1648_v9 }
  0x3a   : > { %1477 = vset.pattern.permute.xlu0 %v1649_v10  ;;  %305 = vperm.xlu1 %1476, %v1750_v2  }
  0x3b   : > { %336 = vperm.xlu0 %1477, %v1750_v2   ;;  %1331 = vmatpush3.bf16.msra.mxu0 %v1502_v27 }
  0x3c   : > { %1353 = vmatpush3.bf16.msra.mxu1 %v1503_v28  ;;  %1332 = vmatprep.subr.bf16.mxu0 %v1504_v29 }
  0x3d   : > { %1354 = vmatprep.subr.bf16.mxu1 %v1505_v30 }
  0x3e   : > { %316 = vperm.xlu1 %1476, %v1748_v1  }
  0x3f   : > { %1480 = vset.pattern.permute.xlu0 %v1650_v17  ;;  %1333 = vmatpush3.bf16.msra.mxu0 %v1506_v31 }
  0x40   : > { %378 = vperm.xlu0 %1480, %v1748_v1   ;;  %1355 = vmatpush3.bf16.msra.mxu1 %v1507_v32 }
  0x41   : > { %1334 = vmatprep.subr.bf16.mxu0 %v1508_v34  ;;  %1356 = vmatprep.subr.bf16.mxu1 %v1509_v35 }
  0x42   : > { %1478 = vset.pattern.permute.xlu1 %v1649_v10 }
  0x43   : > { %347 = vperm.xlu1 %1478, %v1748_v1   ;;  %1335 = vmatpush3.bf16.msra.mxu0 %v1510_v36 }
  0x44   : > { %1482 = vset.pattern.permute.xlu0 %v1651_v24  ;;  %1357 = vmatpush3.bf16.msra.mxu1 %v1511_v37 }
  0x45   : > { %429 = vperm.xlu0 %1482, %v1750_v2   ;;  %1336 = vmatprep.subr.bf16.mxu0 %v1512_v38 }
  0x46   : > { %1358 = vmatprep.subr.bf16.mxu1 %v1513_v39 }
  0x47   : > { %1479 = vset.pattern.permute.xlu1 %v1650_v17  ;;  %1337 = vmatpush3.bf16.msra.mxu0 %v1514_v40 }
  0x48   : > { %367 = vperm.xlu1 %1479, %v1750_v2   ;;  %1359 = vmatpush3.bf16.msra.mxu1 %v1515_v41 }
  0x49   : > { %1366 = vmatprep.subr.bf16.mxu0 %v1516_v42  ;;  %1388 = vmatprep.subr.bf16.mxu1 %v1517_v43 }
  0x4c   : > { %1481 = vset.pattern.permute.xlu1 %v1652_v33 }
  0x4d   : > { %398 = vperm.xlu1 %1481, %v1750_v2  }
  0x51   : > { %409 = vperm.xlu1 %1481, %v1748_v1  }
  0x55   : > { %1483 = vset.pattern.permute.xlu1 %v1651_v24 }
  0x56   : > { %440 = vperm.xlu1 %1483, %v1748_v1  }
  0x7a   : > { %1141 = vadd.xlane.f32.xlu1 %v1140_v44 }
  0xa6   : > { %v1769_v46 = vpop.permute.xlu1 %223 }
  0xa7   : > { %v1773_v48 = vpop.permute.xlu0 %211 }
  0xa8   : > { %vm214_vm1 = vcmp.eq.s32.totalorder %v1773_v48, %v1778_v50  ;;  %vm216_vm2 = vcmp.eq.s32.totalorder %v1773_v48, %v1781_v51  ;;  %vm213_vm5 = vcmp.eq.s32.totalorder %v1773_v48, %v1771_v47  ;;  %vm215_vm7 = vcmp.eq.s32.totalorder %v1773_v48, %v1792_v54 }
  0xa9   : > { %v227_v57 = vsel %vm214_vm1, %v1769_v46, 0.0  ;;  %v229_v58 = vsel %vm216_vm2, %v1769_v46, 0.0  ;;  %vm218_vm9 = vcmp.eq.s32.totalorder %v1773_v48, %v1795_v55  ;;  %vm220_vm12 = vcmp.eq.s32.totalorder %v1773_v48, %v1798_v56 }
  0xaa   : > { %v226_v63 = vsel %vm213_vm5, %v1769_v46, 0.0  ;;  %v228_v6 = vsel %vm215_vm7, %v1769_v46, 0.0  ;;  %v231_v17 = vsel %vm218_vm9, %v1769_v46, 0.0  ;;  %v233_v18 = vsel %vm220_vm12, %v1769_v46, 0.0 }
  0xab   : > { %v1775_v49 = vpop.permute.xlu1 %254 }
  0xac   : > { %v1783_v52 = vpop.permute.xlu0 %243 }
  0xad   : > { %vm246_vm3 = vcmp.eq.s32.totalorder %v1783_v52, %v1778_v50  ;;  %vm248_vm4 = vcmp.eq.s32.totalorder %v1783_v52, %v1781_v51  ;;  %vm245_vm6 = vcmp.eq.s32.totalorder %v1783_v52, %v1771_v47  ;;  %vm247_vm8 = vcmp.eq.s32.totalorder %v1783_v52, %v1792_v54 }
  0xae   : > { %v258_v61 = vsel %vm246_vm3, %v1775_v49, 0.0  ;;  %v260_v62 = vsel %vm248_vm4, %v1775_v49, 0.0  ;;  %v257_v0 = vsel %vm245_vm6, %v1775_v49, 0.0  ;;  %v259_v1 = vsel %vm247_vm8, %v1775_v49, 0.0 }
  0xaf   : > { %vm250_vm15 = vcmp.eq.s32.totalorder %v1783_v52, %v1795_v55  ;;  %vm252_vm0 = vcmp.eq.s32.totalorder %v1783_v52, %v1798_v56  ;;  %v266_v3 = vadd.f32 %v258_v61, %v227_v57  ;;  %v268_v7 = vadd.f32 %v260_v62, %v229_v58 }
  0xb0   : > { %v1785_v53 = vpop.permute.xlu1 %274  ;;  %v265_v11 = vadd.f32 %v257_v0, %v226_v63  ;;  %v267_v12 = vadd.f32 %v259_v1, %v228_v6  ;;  %v262_v13 = vsel %vm250_vm15, %v1775_v49, 0.0  ;;  %v264_v14 = vsel %vm252_vm0, %v1775_v49, 0.0 }
  0xb1   : > { %v1818_v60 = vpop.permute.xlu0 %285  ;;  %vm277_vm10 = vcmp.eq.s32.totalorder %v1785_v53, %v1778_v50  ;;  %vm279_vm11 = vcmp.eq.s32.totalorder %v1785_v53, %v1781_v51  ;;  %vm276_vm13 = vcmp.eq.s32.totalorder %v1785_v53, %v1771_v47  ;;  %vm278_vm14 = vcmp.eq.s32.totalorder %v1785_v53, %v1792_v54 }
  0xb2   : > { %v289_v4 = vsel %vm277_vm10, %v1818_v60, 0.0  ;;  %v291_v5 = vsel %vm279_vm11, %v1818_v60, 0.0  ;;  %v288_v8 = vsel %vm276_vm13, %v1818_v60, 0.0  ;;  %v290_v9 = vsel %vm278_vm14, %v1818_v60, 0.0 }
  0xb3   : > { %vm281_vm1 = vcmp.eq.s32.totalorder %v1785_v53, %v1795_v55  ;;  %v297_v15 = vadd.f32 %v289_v4, %v266_v3  ;;  %v299_v16 = vadd.f32 %v291_v5, %v268_v7  ;;  %v296_v19 = vadd.f32 %v288_v8, %v265_v11 }
  0xb4   : > { %v298_v20 = vadd.f32 %v290_v9, %v267_v12  ;;  %v293_v21 = vsel %vm281_vm1, %v1818_v60, 0.0  ;;  %vm283_vm2 = vcmp.eq.s32.totalorder %v1785_v53, %v1798_v56  ;;  %v270_v23 = vadd.f32 %v262_v13, %v231_v17 }
  0xb5   : > { %v1808_v59 = vpop.permute.xlu1 %305  ;;  %v272_v24 = vadd.f32 %v264_v14, %v233_v18  ;;  %v295_v27 = vsel %vm283_vm2, %v1818_v60, 0.0 }
  0xb6   : > { %v1851_v10 = vpop.permute.xlu0 %336  ;;  %vm308_vm3 = vcmp.eq.s32.totalorder %v1808_v59, %v1778_v50  ;;  %vm310_vm5 = vcmp.eq.s32.totalorder %v1808_v59, %v1781_v51  ;;  %vm307_vm7 = vcmp.eq.s32.totalorder %v1808_v59, %v1771_v47  ;;  %vm309_vm9 = vcmp.eq.s32.totalorder %v1808_v59, %v1792_v54 }
  0xb7   : > { %vm339_vm4 = vcmp.eq.s32.totalorder %v1851_v10, %v1778_v50  ;;  %vm341_vm6 = vcmp.eq.s32.totalorder %v1851_v10, %v1781_v51  ;;  %vm338_vm8 = vcmp.eq.s32.totalorder %v1851_v10, %v1771_v47  ;;  %vm340_vm10 = vcmp.eq.s32.totalorder %v1851_v10, %v1792_v54 }
  0xb8   : > { %v301_v26 = vadd.f32 %v293_v21, %v270_v23  ;;  %vm312_vm11 = vcmp.eq.s32.totalorder %v1808_v59, %v1795_v55  ;;  %vm343_vm12 = vcmp.eq.s32.totalorder %v1851_v10, %v1795_v55  ;;  %vm314_vm13 = vcmp.eq.s32.totalorder %v1808_v59, %v1798_v56 }
  0xb9   : > { %v1839_v2 = vpop.permute.xlu1 %316  ;;  %v303_v36 = vadd.f32 %v295_v27, %v272_v24  ;;  %vm345_vm14 = vcmp.eq.s32.totalorder %v1851_v10, %v1798_v56 }
  0xba   : > { %v320_v28 = vsel %vm308_vm3, %v1839_v2, 0.0  ;;  %v322_v29 = vsel %vm310_vm5, %v1839_v2, 0.0  ;;  %v319_v30 = vsel %vm307_vm7, %v1839_v2, 0.0  ;;  %v321_v31 = vsel %vm309_vm9, %v1839_v2, 0.0 }
  0xbb   : > { %v1880_v25 = vpop.permute.xlu0 %378  ;;  %v324_v32 = vsel %vm312_vm11, %v1839_v2, 0.0  ;;  %v326_v37 = vsel %vm314_vm13, %v1839_v2, 0.0  ;;  %v328_v39 = vadd.f32 %v320_v28, %v297_v15  ;;  %v330_v40 = vadd.f32 %v322_v29, %v299_v16 }
  0xbc   : > { %v327_v42 = vadd.f32 %v319_v30, %v296_v19  ;;  %v329_v43 = vadd.f32 %v321_v31, %v298_v20  ;;  %v332_v44 = vadd.f32 %v324_v32, %v301_v26  ;;  %v334_v61 = vadd.f32 %v326_v37, %v303_v36 }
  0xbe   : > { %v1866_v22 = vpop.permute.xlu1 %347 }
  0xbf   : > { %v351_v34 = vsel %vm339_vm4, %v1866_v22, 0.0  ;;  %v353_v35 = vsel %vm341_vm6, %v1866_v22, 0.0  ;;  %v350_v41 = vsel %vm338_vm8, %v1866_v22, 0.0  ;;  %v352_v58 = vsel %vm340_vm10, %v1866_v22, 0.0 }
  0xc0   : > { %v1909_v38 = vpop.permute.xlu0 %429  ;;  %v359_v45 = vadd.f32 %v351_v34, %v328_v39  ;;  %v361_v57 = vadd.f32 %v353_v35, %v330_v40  ;;  %v358_v62 = vadd.f32 %v350_v41, %v327_v42  ;;  %v355_v63 = vsel %vm343_vm12, %v1866_v22, 0.0 }
  0xc1   : > { %vm432_vm15 = vcmp.eq.s32.totalorder %v1909_v38, %v1778_v50  ;;  %vm434_vm0 = vcmp.eq.s32.totalorder %v1909_v38, %v1781_v51  ;;  %vm431_vm1 = vcmp.eq.s32.totalorder %v1909_v38, %v1771_v47  ;;  %v357_v0 = vsel %vm345_vm14, %v1866_v22, 0.0 }
  0xc2   : > { %v360_v3 = vadd.f32 %v352_v58, %v329_v43  ;;  %vm433_vm6 = vcmp.eq.s32.totalorder %v1909_v38, %v1792_v54  ;;  %v363_v4 = vadd.f32 %v355_v63, %v332_v44  ;;  %vm436_vm9 = vcmp.eq.s32.totalorder %v1909_v38, %v1795_v55 }
  0xc3   : > { %v1898_v33 = vpop.permute.xlu1 %367  ;;  %v365_v5 = vadd.f32 %v357_v0, %v334_v61  ;;  %vm438_vm10 = vcmp.eq.s32.totalorder %v1909_v38, %v1798_v56  ;;  %v1518_v61 = vld [vmem:[#allocation2 + $0x138] sm:$0xff]  }
  0xc4   : > { %vm370_vm2 = vcmp.eq.s32.totalorder %v1898_v33, %v1778_v50  ;;  %vm372_vm3 = vcmp.eq.s32.totalorder %v1898_v33, %v1781_v51  ;;  %vm369_vm4 = vcmp.eq.s32.totalorder %v1898_v33, %v1771_v47  ;;  %vm371_vm5 = vcmp.eq.s32.totalorder %v1898_v33, %v1792_v54 }
  0xc5   : > { %vm374_vm7 = vcmp.eq.s32.totalorder %v1898_v33, %v1795_v55  ;;  %vm376_vm8 = vcmp.eq.s32.totalorder %v1898_v33, %v1798_v56  ;;  %v382_v6 = vsel %vm370_vm2, %v1880_v25, 0.0  ;;  %v384_v7 = vsel %vm372_vm3, %v1880_v25, 0.0 }
  0xc6   : > { %v381_v8 = vsel %vm369_vm4, %v1880_v25, 0.0  ;;  %v383_v9 = vsel %vm371_vm5, %v1880_v25, 0.0  ;;  %v386_v12 = vsel %vm374_vm7, %v1880_v25, 0.0  ;;  %v388_v13 = vsel %vm376_vm8, %v1880_v25, 0.0 }
  0xc7   : > { %v390_v16 = vadd.f32 %v382_v6, %v359_v45  ;;  %v392_v17 = vadd.f32 %v384_v7, %v361_v57  ;;  %v389_v20 = vadd.f32 %v381_v8, %v358_v62  ;;  %v391_v21 = vadd.f32 %v383_v9, %v360_v3  ;;  %v1519_v62 = vld [vmem:[#allocation2 + $0x1b8] sm:$0xff]   ;;  %v1520_v3 = vld [vmem:[#allocation2 + $0x170] sm:$0xff]   ;;  %v1524_v7 = vld [vmem:[#allocation2 + $0x168] sm:$0xff]  }
  0xc8   : > { %v1932_v1 = vpop.permute.xlu1 %398  ;;  %v394_v23 = vadd.f32 %v386_v12, %v363_v4  ;;  %v396_v27 = vadd.f32 %v388_v13, %v365_v5  ;;  %v1521_v4 = vld [vmem:[#allocation2 + $0x1f0] sm:$0xff]   ;;  %v1525_v8 = vld [vmem:[#allocation2 + $0x1e8] sm:$0xff]   ;;  %v2005_v9 = vadd.s32 512, %v1771_v47  ;;  %v2008_v12 = vadd.s32 768, %v1771_v47 }
  0xc9   : > { %vm401_vm11 = vcmp.eq.s32.totalorder %v1932_v1, %v1778_v50  ;;  %vm403_vm12 = vcmp.eq.s32.totalorder %v1932_v1, %v1781_v51  ;;  %vm400_vm13 = vcmp.eq.s32.totalorder %v1932_v1, %v1771_v47  ;;  %vm402_vm14 = vcmp.eq.s32.totalorder %v1932_v1, %v1792_v54  ;;  %v1523_v6 = vld [vmem:[#allocation2 + $0x1b0] sm:$0xff]   ;;  %v1526_v13 = vld [vmem:[#allocation2 + $0x128] sm:$0xff]   ;;  %v1530_v47 = vld [vmem:[#allocation2 + $0x120] sm:$0xff]  }
  0xca   : > { %vm405_vm2 = vcmp.eq.s32.totalorder %v1932_v1, %v1795_v55  ;;  %vm407_vm3 = vcmp.eq.s32.totalorder %v1932_v1, %v1798_v56  ;;  %v1522_v56 = vld [vmem:[#allocation2 + $0x130] sm:$0xff]   ;;  %vm219_vm4 = vcmp.eq.s32.totalorder %v1773_v48, %v2008_v12  ;;  %vm280_vm5 = vcmp.eq.s32.totalorder %v1785_v53, %v2005_v9 }
  0xcb   : > { %vm311_vm7 = vcmp.eq.s32.totalorder %v1808_v59, %v2005_v9  ;;  %vm342_vm8 = vcmp.eq.s32.totalorder %v1851_v10, %v2005_v9 }
  0xcc   : > { %v1956_v11 = vpop.permute.xlu1 %409 }
  0xcd   : > { %v413_v14 = vsel %vm401_vm11, %v1956_v11, 0.0  ;;  %v415_v15 = vsel %vm403_vm12, %v1956_v11, 0.0  ;;  %v412_v18 = vsel %vm400_vm13, %v1956_v11, 0.0  ;;  %v414_v19 = vsel %vm402_vm14, %v1956_v11, 0.0 }
  0xce   : > { %v421_v24 = vadd.f32 %v413_v14, %v390_v16  ;;  %v423_v26 = vadd.f32 %v415_v15, %v392_v17  ;;  %v420_v29 = vadd.f32 %v412_v18, %v389_v20  ;;  %v422_v30 = vadd.f32 %v414_v19, %v391_v21  ;;  %v1527_v14 = vld [vmem:[#allocation2 + $0x1a8] sm:$0xff]   ;;  %v1528_v15 = vld [vmem:[#allocation2 + $0x160] sm:$0xff]   ;;  %v1533_v19 = vld [vmem:[#allocation2 + $0x1d8] sm:$0xff]  }
  0xcf   : > { %v417_v31 = vsel %vm405_vm2, %v1956_v11, 0.0  ;;  %v419_v32 = vsel %vm407_vm3, %v1956_v11, 0.0  ;;  %v1529_v16 = vld [vmem:[#allocation2 + $0x1e0] sm:$0xff]   ;;  %v232_v21 = vsel %vm219_vm4, %v1769_v46, 0.0  ;;  %vm373_vm11 = vcmp.eq.s32.totalorder %v1898_v33, %v2005_v9 }
  0xd0   : > { %v425_v42 = vadd.f32 %v417_v31, %v394_v23  ;;  %v427_v43 = vadd.f32 %v419_v32, %v396_v27  ;;  %v1531_v17 = vld [vmem:[#allocation2 + $0x1a0] sm:$0xff]   ;;  %v292_v23 = vsel %vm280_vm5, %v1818_v60, 0.0  ;;  %vm375_vm12 = vcmp.eq.s32.totalorder %v1898_v33, %v2008_v12 }
  0xd1   : > { %v1976_v28 = vpop.permute.xlu1 %440  ;;  %vm435_vm13 = vcmp.eq.s32.totalorder %v1909_v38, %v2005_v9  ;;  %v387_v33 = vsel %vm375_vm12, %v1880_v25, 0.0  ;;  %vm404_vm14 = vcmp.eq.s32.totalorder %v1932_v1, %v2005_v9  ;;  %vm406_vm2 = vcmp.eq.s32.totalorder %v1932_v1, %v2008_v12 }
  0xd2   : > { %v444_v34 = vsel %vm432_vm15, %v1976_v28, 0.0  ;;  %v446_v35 = vsel %vm434_vm0, %v1976_v28, 0.0  ;;  %v443_v36 = vsel %vm431_vm1, %v1976_v28, 0.0  ;;  %v445_v37 = vsel %vm433_vm6, %v1976_v28, 0.0 }
  0xd3   : > { %v452_v39 = vadd.f32 %v444_v34, %v421_v24  ;;  %v454_v40 = vadd.f32 %v446_v35, %v423_v26  ;;  %v451_v41 = vadd.f32 %v443_v36, %v420_v29  ;;  %v453_v50 = vadd.f32 %v445_v37, %v422_v30  ;;  %v1534_v24 = vld [vmem:[#allocation2 + $0x118] sm:$0xff]   ;;  %v1537_v29 = vld [vmem:[#allocation2 + $0x1d0] sm:$0xff]  }
  0xd4   : > { %v448_v51 = vsel %vm436_vm9, %v1976_v28, 0.0  ;;  %v450_v44 = vsel %vm438_vm10, %v1976_v28, 0.0  ;;  %vm249_vm15 = vcmp.eq.s32.totalorder %v1783_v52, %v2005_v9  ;;  %vm251_vm0 = vcmp.eq.s32.totalorder %v1783_v52, %v2008_v12  ;;  %v1532_v52 = vld [vmem:[#allocation2 + $0x158] sm:$0xff]   ;;  %v1539_v36 = vld [vmem:[#allocation2 + $0x190] sm:$0xff]  }
  0xd5   : > { %v460_v45 = vpack.c.bf16 %v452_v39, %v452_v39  ;;  %v462_v57 = vpack.c.bf16 %v454_v40, %v454_v40  ;;  %v459_v54 = vpack.c.bf16 %v451_v41, %v451_v41  ;;  %v461_v58 = vpack.c.bf16 %v453_v50, %v453_v50  ;;  %v1535_v26 = vld [vmem:[#allocation2 + $0x198] sm:$0xff]  }
  0xd6   : > { %v456_v63 = vadd.f32 %v448_v51, %v425_v42  ;;  %v458_v0 = vadd.f32 %v450_v44, %v427_v43  ;;  %vm217_vm1 = vcmp.eq.s32.totalorder %v1773_v48, %v2005_v9  ;;  %v261_v18 = vsel %vm249_vm15, %v1775_v49, 0.0  ;;  %v1543_v42 = vld [vmem:[#allocation2 + $0x188] sm:$0xff]   ;;  %v1545_v44 = vld [vmem:[#allocation2 + $0x1c0] sm:$0xff]  }
  0xd7   : > { %1011 = vmatprep.mubr.bf16.mxu0 %v460_v45  ;;  %1051 = vmatprep.mubr.bf16.mxu1 %v462_v57  ;;  %vm282_vm6 = vcmp.eq.s32.totalorder %v1785_v53, %v2008_v12  ;;  %v263_v20 = vsel %vm251_vm0, %v1775_v49, 0.0  ;;  %v230_v48 = vsel %vm217_vm1, %v1769_v46, 0.0  ;;  %v1536_v46 = vld [vmem:[#allocation2 + $0x150] sm:$0xff]   ;;  %v323_v30 = vsel %vm311_vm7, %v1839_v2, 0.0 }
  0xd8   : > { %1012 = vmatmul.mubr.bf16.vlgmr.msra.gmra.mxu0 %v459_v54  ;;  %1052 = vmatmul.mubr.bf16.vlgmr.msra.gmra.mxu1 %v461_v58  ;;  %v464_v55 = vpack.c.bf16 %v456_v63, %v456_v63  ;;  %v466_v5 = vpack.c.bf16 %v458_v0, %v458_v0  ;;  %v269_v27 = vadd.f32 %v261_v18, %v230_v48  ;;  %v294_v49 = vsel %vm282_vm6, %v1818_v60, 0.0  ;;  %v1538_v60 = vld [vmem:[#allocation2 + $0x110] sm:$0xff]   ;;  %v1547_v63 = vld [vmem:[#allocation2 + $0x180] sm:$0xff]  }
  0xd9   : > { %1367 = vmatpush3.bf16.msra.mxu0 %v1518_v61  ;;  %1389 = vmatpush3.bf16.msra.mxu1 %v1519_v62  ;;  %v271_v31 = vadd.f32 %v263_v20, %v232_v21  ;;  %vm313_vm9 = vcmp.eq.s32.totalorder %v1808_v59, %v2008_v12  ;;  %vm344_vm10 = vcmp.eq.s32.totalorder %v1851_v10, %v2008_v12  ;;  %v354_v35 = vsel %vm342_vm8, %v1866_v22, 0.0  ;;  %v1540_v10 = vld [vmem:[#allocation2 + $0x148] sm:$0xff]   ;;  %v1546_v62 = vld [vmem:[#allocation2 + $0x100] sm:$0xff]  }
  0xda   : > { %1091 = vmatprep.mubr.bf16.mxu0 %v464_v55  ;;  %1131 = vmatprep.mubr.bf16.mxu1 %v466_v5  ;;  %v300_v32 = vadd.f32 %v292_v23, %v269_v27  ;;  %v325_v34 = vsel %vm313_vm9, %v1839_v2, 0.0  ;;  %v356_v37 = vsel %vm344_vm10, %v1866_v22, 0.0  ;;  %v1541_v2 = vld [vmem:[#allocation2 + $0x1c8] sm:$0xff]   ;;  %v385_v41 = vsel %vm373_vm11, %v1880_v25, 0.0  ;;  %v1544_v25 = vld [vmem:[#allocation2 + $0x140] sm:$0xff]  }
  0xdb   : > { %1368 = vmatprep.subr.bf16.mxu0 %v1520_v3  ;;  %1390 = vmatprep.subr.bf16.mxu1 %v1521_v4  ;;  %v302_v53 = vadd.f32 %v294_v49, %v271_v31  ;;  %vm437_vm3 = vcmp.eq.s32.totalorder %v1909_v38, %v2008_v12  ;;  %v1542_v22 = vld [vmem:[#allocation2 + $0x108] sm:$0xff]   ;;  %v416_v51 = vsel %vm404_vm14, %v1956_v11, 0.0  ;;  %v418_v43 = vsel %vm406_vm2, %v1956_v11, 0.0 }
  0xdc   : > { %v331_v59 = vadd.f32 %v323_v30, %v300_v32  ;;  %v447_v1 = vsel %vm435_vm13, %v1976_v28, 0.0  ;;  %v449_v54 = vsel %vm437_vm3, %v1976_v28, 0.0 }
  0xdd   : > { %1369 = vmatpush3.bf16.msra.mxu0 %v1522_v56  ;;  %1391 = vmatpush3.bf16.msra.mxu1 %v1523_v6  ;;  %v333_v39 = vadd.f32 %v325_v34, %v302_v53 }
  0xde   : > { %1370 = vmatprep.subr.bf16.mxu0 %v1524_v7  ;;  %1392 = vmatprep.subr.bf16.mxu1 %v1525_v8  ;;  %v362_v40 = vadd.f32 %v354_v35, %v331_v59 }
  0xdf   : > { %v364_v50 = vadd.f32 %v356_v37, %v333_v39 }
  0xe0   : > { %v393_v45 = vadd.f32 %v385_v41, %v362_v40 }
  0xe1   : > { %1371 = vmatpush3.bf16.msra.mxu0 %v1526_v13  ;;  %1393 = vmatpush3.bf16.msra.mxu1 %v1527_v14  ;;  %v395_v57 = vadd.f32 %v387_v33, %v364_v50 }
  0xe2   : > { %1372 = vmatprep.subr.bf16.mxu0 %v1528_v15  ;;  %1394 = vmatprep.subr.bf16.mxu1 %v1529_v16  ;;  %v424_v58 = vadd.f32 %v416_v51, %v393_v45 }
  0xe3   : > { %v426_v61 = vadd.f32 %v418_v43, %v395_v57 }
  0xe4   : > { %v455_v11 = vadd.f32 %v447_v1, %v424_v58 }
  0xe5   : > { %1373 = vmatpush3.bf16.msra.mxu0 %v1530_v47  ;;  %1395 = vmatpush3.bf16.msra.mxu1 %v1531_v17  ;;  %v457_v0 = vadd.f32 %v449_v54, %v426_v61 }
  0xe6   : > { %1374 = vmatprep.subr.bf16.mxu0 %v1532_v52  ;;  %1396 = vmatprep.subr.bf16.mxu1 %v1533_v19  ;;  %v463_v3 = vpack.c.bf16 %v455_v11, %v455_v11 }
  0xe7   : > { %v465_v4 = vpack.c.bf16 %v457_v0, %v457_v0 }
  0xe9   : > { %1375 = vmatpush3.bf16.msra.mxu0 %v1534_v24  ;;  %1397 = vmatpush3.bf16.msra.mxu1 %v1535_v26 }
  0xea   : > { %1376 = vmatprep.subr.bf16.mxu0 %v1536_v46  ;;  %1398 = vmatprep.subr.bf16.mxu1 %v1537_v29 }
  0xed   : > { %1377 = vmatpush3.bf16.msra.mxu0 %v1538_v60  ;;  %1399 = vmatpush3.bf16.msra.mxu1 %v1539_v36 }
  0xee   : > { %1378 = vmatprep.subr.bf16.mxu0 %v1540_v10  ;;  %1400 = vmatprep.subr.bf16.mxu1 %v1541_v2 }
  0xf1   : > { %1379 = vmatpush3.bf16.msra.mxu0 %v1542_v22  ;;  %1401 = vmatpush3.bf16.msra.mxu1 %v1543_v42 }
  0xf2   : > { %1380 = vmatprep.subr.bf16.mxu0 %v1544_v25  ;;  %1402 = vmatprep.subr.bf16.mxu1 %v1545_v44 }
  0xf5   : > { %1381 = vmatpush3.bf16.msra.mxu0 %v1546_v62  ;;  %1403 = vmatpush3.bf16.msra.mxu1 %v1547_v63 }
  0xf8   : > { %1092 = vmatmul.mubr.bf16.vlgmr.msra.gmra.mxu0 %v463_v3  ;;  %1132 = vmatmul.mubr.bf16.vlgmr.msra.gmra.mxu1 %v465_v4 }
 0x103   : > { %v1142_v9 = vpop.xlane.xlu1 %1141 }
 0x104   : > { %vm1143_vm15 = vcmp.eq.f32.partialorder %v1142_v9, 0.0 }
 0x105   : > { %v1144_v12 = vsel %vm1143_vm15, 1.0, %v1142_v9 }
 0x106   : > { %1548 = vrcp.f32 %v1144_v12 }
 0x113   : > { %v1549_v23 = vpop.eup %1548 }
 0x198   : > { %v1338_v38 = vpop.f32.mrf.mxu0  ;;  %v1360_v55 = vpop.f32.mrf.mxu1 }
 0x19a   : > { %v1339_v28 = vpop.f32.mrf.mxu0  ;;  %v1361_v5 = vpop.f32.mrf.mxu1 }
 0x19b   : > { %v1340_v13 = vadd.f32 %v1339_v28, %v1338_v38  ;;  %v1362_v14 = vadd.f32 %v1361_v5, %v1360_v55 }
 0x19c   : > { %v1341_v56 = vpop.f32.mrf.mxu0  ;;  %v1363_v6 = vpop.f32.mrf.mxu1 }
 0x19d   : > { %v1054_v18 = vadd.f32 %v1362_v14, %v1340_v13 }
 0x19e   : > { %v1342_v7 = vpop.f32.mrf.mxu0  ;;  %v1364_v8 = vpop.f32.mrf.mxu1 }
 0x1b8   : > { %v1382_v15 = vpop.f32.mrf.mxu0  ;;  %v1404_v16 = vpop.f32.mrf.mxu1 }
 0x1ba   : > { %v1383_v47 = vpop.f32.mrf.mxu0  ;;  %v1405_v17 = vpop.f32.mrf.mxu1 }
 0x1bb   : > { %v1384_v52 = vadd.f32 %v1383_v47, %v1382_v15  ;;  %v1406_v21 = vadd.f32 %v1405_v17, %v1404_v16 }
 0x1bc   : > { %v1385_v19 = vpop.f32.mrf.mxu0  ;;  %v1407_v20 = vpop.f32.mrf.mxu1 }
 0x1bd   : > { %v1094_v48 = vadd.f32 %v1384_v52, %v1054_v18 }
 0x1be   : > { %v1386_v24 = vpop.f32.mrf.mxu0  ;;  %v1408_v26 = vpop.f32.mrf.mxu1 }
 0x1bf   : > { %v1134_v27 = vadd.f32 %v1406_v21, %v1094_v48 }
 0x1c1   : > { %v1146_v49 = vmul.f32 %v1549_v23, %v1134_v27 }
 0x1c3   : > { %1147 = vst [vmem:[%s189_s25] sm:$0xff] %v1146_v49 }
 0x1c4   : > { %1589 = shalt.err (!%p1586_p0)
}
 0x1c5   : > { %s1590_s7 = scalar_lea.hbm %s1160_s29, 128  ;;  %s1594_s10 = scalar_lea.hbm %s2101_s3, 256 }
 0x1c6   : > { %p1591_p1 = scmp.ne.s32.totalorder %s1160_s29, %s1590_s7  ;;  %p1595_p4 = scmp.lt.s32.totalorder %s1160_s29, %s2101_s3 }
 0x1c7   : > { %p1596_p7 = scmp.lt.s32.totalorder %s1594_s10, %s1590_s7 }
 0x1c8   : > { %p1592_p2 = pnand %p1591_p1, %p1712_p5 }
 0x1c9   : > { %p1597_p8 = por %p1596_p7, %p1595_p4 }
 0x1ca   : > { %p1593_p3 = pneg %p1592_p2 }
 0x1cc   : > { %p1598_p6 = pnand %p1597_p8, %p1593_p3 }
 0x1ce   : > { %1601 = shalt.err (!%p1598_p6)
}
 0x1cf   : > { %1414 = dma.vmem_to_hbm [thread:$0]  (%p1712_p5), %s1163_s26, 128, %s1160_s29, %s1149_s30  }
 0x1d0 PF: > { %p1426_p9 = scmp.ge.s32.totalorder %s1640_s15, 2  ;;  %s1174_s19 = sand.u32 1, %s1628_s12  }
 0x1d1   : > { %p2105_p10 = scmp.ne.s32.totalorder %s2103_s23, 0  ;;  %s1175_s20 = scalar_lea.sflag [#allocation4], %s1174_s19 }
 0x1d3   : > { %p1421_p11 = pnand %p1426_p9, %p2105_p10 }
 0x1d5   : > { %p1422_p12 = pneg %p1421_p11 }
 0x1d7   : > { %1623 = dma.done.wait (%p1422_p12), %s1175_s20, 128  }
 0x1d8   : > { %1625 = vsyncadd (%p1422_p12), %s1175_s20, 4294967168  ;;  %p14_p13 = scmp.ge.s32.totalorder %s1699_s18, 4   ;;  %s2106_s12 = smov %s1632_s13 }
 0x1d9   : > { %s2107_s13 = smov %s1636_s14  ;;  %s2108_s14 = smov %s1710_s21 }
 0x1da   : > { %s2109_s15 = smov %s1699_s18  ;;  %16 = sbr.rel (!%p14_p13) target bundleno = 4 (0x4), region = 75 }
 0x1df   :  { %1180 = vsyncpa [#allocation3], 1 }
 0x1e0   :  { %1182 = vsyncpa [#allocation3 + $0x1], 1 }
 0x1e1   :  { %1183 = vsyncpa [#allocation4], 1 }
 0x1e2   :  { %1185 = vsyncpa [#allocation4 + $0x1], 1 }

</bundles_post_ra>
